<compile_context>
chip_gen: v5e
topology: v5e:2x2
jax: 0.10.0
libtpu: 0.0.40
codegen_flags: <defaults>
</compile_context>

<pallas_src>
import math

import jax
import jax.numpy as jnp
from jax.experimental import pallas as pl
from jax.experimental.pallas import tpu as pltpu

BN_EPS = 1e-5
LN_EPS = 1e-5


def _round_up(x, m):
    return ((x + m - 1) // m) * m


def _pick_tile(dim, align, cap, prefs):
    """Pick a tile size: single full block if small, else the largest pref that divides."""
    d = _round_up(dim, align)
    if d <= cap:
        return d
    for t in prefs:
        if d % t == 0:
            return t
    return prefs[0]


# ----------------------------------------------------------------------------
# Pallas kernel 1: fused (optionally batched) matmul  out = act(A @ B + bias + res)
# Used for every conv (via im2col), transposed-conv phase, dynamic conv and Linear.
# ----------------------------------------------------------------------------
def _make_matmul_kernel(has_bias, has_res, act):
    def kernel(*refs):
        i = 0
        a_ref = refs[i]; i += 1
        b_ref = refs[i]; i += 1
        bias_ref = None
        res_ref = None
        if has_bias:
            bias_ref = refs[i]; i += 1
        if has_res:
            res_ref = refs[i]; i += 1
        o_ref = refs[i]
        acc_ref = refs[i + 1]

        k = pl.program_id(3)

        @pl.when(k == 0)
        def _():
            acc_ref[...] = jnp.zeros_like(acc_ref)

        acc_ref[...] += jnp.dot(a_ref[0], b_ref[0],
                                preferred_element_type=jnp.float32)

        @pl.when(k == pl.num_programs(3) - 1)
        def _():
            r = acc_ref[...]
            if has_bias:
                r = r + bias_ref[0].astype(jnp.float32)
            if has_res:
                r = r + res_ref[0].astype(jnp.float32)
            if act == "relu":
                r = jnp.maximum(r, 0.0)
            elif act == "sigmoid":
                r = 1.0 / (1.0 + jnp.exp(-r))
            o_ref[0] = r.astype(o_ref.dtype)

    return kernel


def matmul_fused(a, b, bias=None, residual=None, act="none",
                 out_dtype=jnp.float32):
    """Fused matmul.

    2-D: a:(M,K) b:(K,N) bias:(N,) residual:(M,N)        -> (M,N)
    3-D: a:(G,M,K) b:(G,K,N) bias:(G,N) residual:(G,M,N) -> (G,M,N)
    Operands go to the MXU in bf16; accumulation & epilogue are fp32.
    """
    squeeze = a.ndim == 2
    if squeeze:
        a = a[None]
        b = b[None]
        if bias is not None:
            bias = bias.reshape(1, 1, -1)
        if residual is not None:
            residual = residual[None]
    elif bias is not None and bias.ndim == 2:
        bias = bias[:, None, :]

    G, M, K = a.shape
    N = b.shape[2]
    assert b.shape[0] == G and b.shape[1] == K

    tm = _pick_tile(M, 16, 512, (512, 384, 256, 128))
    tn = _pick_tile(N, 128, 512, (512, 384, 256, 128))
    tk = _pick_tile(K, 16, 1024, (512, 384, 256, 128))
    Mp, Np, Kp = _round_up(M, tm), _round_up(N, tn), _round_up(K, tk)

    a_p = jnp.pad(a.astype(jnp.bfloat16), ((0, 0), (0, Mp - M), (0, Kp - K)))
    b_p = jnp.pad(b.astype(jnp.bfloat16), ((0, 0), (0, Kp - K), (0, Np - N)))
    inputs = [a_p, b_p]
    in_specs = [pl.BlockSpec((1, tm, tk), lambda g, i, j, k: (g, i, k)),
                pl.BlockSpec((1, tk, tn), lambda g, i, j, k: (g, k, j))]
    if bias is not None:
        bias_p = jnp.pad(bias.astype(jnp.float32),
                         ((0, 0), (0, 0), (0, Np - N)))
        inputs.append(bias_p)
        in_specs.append(pl.BlockSpec((1, 1, tn), lambda g, i, j, k: (g, 0, j)))
    if residual is not None:
        res_p = jnp.pad(residual, ((0, 0), (0, Mp - M), (0, Np - N)))
        inputs.append(res_p)
        in_specs.append(pl.BlockSpec((1, tm, tn), lambda g, i, j, k: (g, i, j)))

    kernel = _make_matmul_kernel(bias is not None, residual is not None, act)
    out = pl.pallas_call(
        kernel,
        out_shape=jax.ShapeDtypeStruct((G, Mp, Np), out_dtype),
        grid_spec=pltpu.PrefetchScalarGridSpec(
            num_scalar_prefetch=0,
            grid=(G, Mp // tm, Np // tn, Kp // tk),
            in_specs=in_specs,
            out_specs=pl.BlockSpec((1, tm, tn), lambda g, i, j, k: (g, i, j)),
            scratch_shapes=[pltpu.VMEM((tm, tn), jnp.float32)]),
        compiler_params=pltpu.CompilerParams(
            dimension_semantics=("parallel", "parallel", "parallel", "arbitrary"),
            vmem_limit_bytes=32 * 1024 * 1024),
    )(*inputs)
    out = out[:, :M, :N]
    return out[0] if squeeze else out


# ----------------------------------------------------------------------------
# Pallas kernel 2: LayerNorm over the last dim (ViT PreNorm)
# ----------------------------------------------------------------------------
def _ln_kernel(x_ref, g_ref, b_ref, o_ref):
    x = x_ref[...].astype(jnp.float32)
    mu = jnp.mean(x, axis=-1, keepdims=True)
    xc = x - mu
    var = jnp.mean(xc * xc, axis=-1, keepdims=True)
    o_ref[...] = (xc * jax.lax.rsqrt(var + LN_EPS) * g_ref[...]
                  + b_ref[...]).astype(o_ref.dtype)


def layernorm(x, gamma, beta):
    M, D = x.shape
    Mp = _round_up(M, 16)
    tm = Mp if Mp <= 2048 else 256
    Mp = _round_up(M, tm)
    x_p = jnp.pad(x.astype(jnp.float32), ((0, Mp - M), (0, 0)))
    out = pl.pallas_call(
        _ln_kernel,
        out_shape=jax.ShapeDtypeStruct((Mp, D), jnp.float32),
        grid_spec=pltpu.PrefetchScalarGridSpec(
            num_scalar_prefetch=0,
            grid=(Mp // tm,),
            in_specs=[pl.BlockSpec((tm, D), lambda i: (i, 0)),
                      pl.BlockSpec((1, D), lambda i: (0, 0)),
                      pl.BlockSpec((1, D), lambda i: (0, 0))],
            out_specs=pl.BlockSpec((tm, D), lambda i: (i, 0))),
    )(x_p, gamma.reshape(1, D), beta.reshape(1, D))
    return out[:M]


# ----------------------------------------------------------------------------
# Pallas kernel 3: batched attention  softmax(Q K^T * scale) V over all (B*H) slices
# ----------------------------------------------------------------------------
def _make_attn_kernel(n_valid, scale):
    def kernel(q_ref, k_ref, v_ref, o_ref):
        q = q_ref[...]
        k = k_ref[...]
        v = v_ref[...]
        s = jnp.einsum('bqd,bkd->bqk', q, k,
                       preferred_element_type=jnp.float32) * scale
        col = jax.lax.broadcasted_iota(jnp.int32, s.shape, 2)
        s = jnp.where(col < n_valid, s, -1e30)
        s = s - jnp.max(s, axis=-1, keepdims=True)
        p = jnp.exp(s)
        p = p / jnp.sum(p, axis=-1, keepdims=True)
        o_ref[...] = jnp.einsum('bqk,bkd->bqd', p.astype(v.dtype), v,
                                preferred_element_type=jnp.float32)

    return kernel


def mha_attention(q, k, v, scale):
    """q,k,v: (B*H, n, d) -> (B*H, n, d) in one batched kernel invocation."""
    BH, n, d = q.shape
    n_pad = _round_up(n, 128)
    pad = ((0, 0), (0, n_pad - n), (0, 0))
    q_p = jnp.pad(q.astype(jnp.bfloat16), pad)
    k_p = jnp.pad(k.astype(jnp.bfloat16), pad)
    v_p = jnp.pad(v.astype(jnp.bfloat16), pad)
    out = pl.pallas_call(
        _make_attn_kernel(n, scale),
        out_shape=jax.ShapeDtypeStruct((BH, n_pad, d), jnp.float32),
        grid_spec=pltpu.PrefetchScalarGridSpec(
            num_scalar_prefetch=0,
            grid=(1,),
            in_specs=[pl.BlockSpec((BH, n_pad, d), lambda b: (0, 0, 0)),
                      pl.BlockSpec((BH, n_pad, d), lambda b: (0, 0, 0)),
                      pl.BlockSpec((BH, n_pad, d), lambda b: (0, 0, 0))],
            out_specs=pl.BlockSpec((BH, n_pad, d), lambda b: (0, 0, 0))),
    )(q_p, k_p, v_p)
    return out[:, :n, :]


# ----------------------------------------------------------------------------
# Conv glue (im2col / phase decomposition) — reshape-only, feeds the Pallas matmul.
# ----------------------------------------------------------------------------
def im2col(x, kh, kw, stride, pt, pb, pl_, pr):
    """x: (N,H,W,C) -> (N, oh, ow, kh*kw*C) patches (feature order (kh,kw,C))."""
    x = jnp.pad(x, ((0, 0), (pt, pb), (pl_, pr), (0, 0)))
    N, H, W, C = x.shape
    oh = (H - kh) // stride + 1
    ow = (W - kw) // stride + 1
    cols = []
    for i in range(kh):
        for j in range(kw):
            cols.append(x[:, i:i + (oh - 1) * stride + 1:stride,
                          j:j + (ow - 1) * stride + 1:stride, :])
    p = jnp.stack(cols, axis=3)                  # (N, oh, ow, kh*kw, C)
    return p.reshape(N, oh, ow, kh * kw * C), oh, ow


def zero_dilate(x, stride):
    if stride == 1:
        return x
    N, H, W, C = x.shape
    out = jnp.zeros((N, (H - 1) * stride + 1, (W - 1) * stride + 1, C), x.dtype)
    return out.at[:, ::stride, ::stride, :].set(x)


def conv_block(x, p, k, stride, pads, residual, act, out_dtype=jnp.bfloat16):
    """Conv2d block: act((x * W + b) folded-through-BN [+ x])."""
    kh = kw = k
    cin = p["w"].shape[2]
    cout = p["w"].shape[3]
    patches, oh, ow = im2col(x, kh, kw, stride, *pads)
    N = x.shape[0]
    a = patches.reshape(N * oh * ow, kh * kw * cin)
    w2 = p["w"].reshape(kh * kw * cin, cout) * p["bn_s"]      # fold BN scale
    b2 = p["b"] * p["bn_s"] + p["bn_t"]                       # fold BN shift
    res = x.reshape(N * oh * ow, cout) if residual else None
    o = matmul_fused(a, w2, bias=b2, residual=res, act=act, out_dtype=out_dtype)
    return o.reshape(N, oh, ow, cout)


def conv_transpose_phase2(x, p):
    """ConvTranspose2d(k=3, stride=2, pad=1, out_pad=1) + BN + ReLU via the
    4-phase sub-kernel decomposition (no zero-dilated input, ~4x less MXU work)."""
    N, H, W, cin = x.shape
    w = p["w"].astype(jnp.float32)                            # (3,3,cin,cout)
    cout = w.shape[3]
    bn_s, bn_t = p["bn_s"], p["bn_t"]
    b2 = p["b"] * bn_s + bn_t

    xp = jnp.pad(x, ((0, 0), (0, 1), (0, 1), (0, 0)))         # pad bottom/right by 1
    x00 = xp[:, :H, :W]            # x[a,   b]
    x01 = xp[:, :H, 1:W + 1]       # x[a,   b+1]
    x10 = xp[:, 1:H + 1, :W]       # x[a+1, b]
    x11 = xp[:, 1:H + 1, 1:W + 1]  # x[a+1, b+1]

    def run(views, taps):
        a = jnp.concatenate(views, axis=-1).reshape(N * H * W, len(views) * cin)
        wm = jnp.concatenate([w[ky, kx] for ky, kx in taps], axis=0) * bn_s
        o = matmul_fused(a, wm, bias=b2, act="relu", out_dtype=jnp.bfloat16)
        return o.reshape(N, H, W, cout)

    # out[2a,   2b  ] = x[a,b]·W11
    # out[2a,   2b+1] = x[a,b]·W10 + x[a,b+1]·W12
    # out[2a+1, 2b  ] = x[a,b]·W01 + x[a+1,b]·W21
    # out[2a+1, 2b+1] = x[a,b]·W00 + x[a,b+1]·W02 + x[a+1,b]·W20 + x[a+1,b+1]·W22
    o00 = run([x00], [(1, 1)])
    o01 = run([x00, x01], [(1, 0), (1, 2)])
    o10 = run([x00, x10], [(0, 1), (2, 1)])
    o11 = run([x00, x01, x10, x11], [(0, 0), (0, 2), (2, 0), (2, 2)])

    out = jnp.zeros((N, 2 * H, 2 * W, cout), jnp.bfloat16)
    out = out.at[:, 0::2, 0::2].set(o00)
    out = out.at[:, 0::2, 1::2].set(o01)
    out = out.at[:, 1::2, 0::2].set(o10)
    out = out.at[:, 1::2, 1::2].set(o11)
    return out


def conv_transpose_block(x, p, k, stride, pad, out_pad):
    """ConvTranspose2d + BN + ReLU."""
    if stride == 2 and k == 3 and pad == 1 and out_pad == 1:
        return conv_transpose_phase2(x, p)
    # generic fallback: dilate + pad + regular conv
    xd = zero_dilate(x, stride)
    pt = k - 1 - pad
    pb = pt + out_pad
    return conv_block(xd, p, k, 1, (pt, pb, pt, pb), False, "relu")


def dyn_conv_block(x, p, k, pad, residual, act):
    # TODO(synk): Dynamic_conv2d source not provided; standard K-expert dynamic
    # convolution (softmax attention over K kernels, temperature) + BN + ReLU assumed.
    N, H, W, cin = x.shape
    K = p["K"]
    cout = p["weight"].shape[-1]
    # tiny attention branch (avgpool + 2 linears + softmax): negligible, plain JAX glue
    pooled = jnp.mean(x.astype(jnp.float32), axis=(1, 2))           # (N, cin)
    h = jnp.maximum(pooled @ p["att_fc1_w"].T, 0.0)
    logits = h @ p["att_fc2_w"].T + p["att_fc2_b"]
    att = jax.nn.softmax(logits / p["temperature"], axis=-1)        # (N, K)

    kkc = k * k * cin
    w_flat = p["weight"].reshape(K, kkc * cout)
    w_mix = (att @ w_flat).reshape(N, kkc, cout) * p["bn_s"]        # per-sample weights
    b_mix = (att @ p["bias"]) * p["bn_s"] + p["bn_t"]               # (N, cout)

    patches, oh, ow = im2col(x, k, k, 1, pad, pad, pad, pad)
    a = patches.reshape(N, oh * ow, kkc)
    res = x.reshape(N, oh * ow, cout) if residual else None
    # one batched pallas_call over all samples (leading grid axis selects the weights)
    o = matmul_fused(a, w_mix, bias=b_mix, residual=res, act=act,
                     out_dtype=jnp.bfloat16)
    return o.reshape(N, oh, ow, cout)


# ----------------------------------------------------------------------------
# ViT audio encoder (image_size=(80,16), patch=4, dim=512, depth=3, heads=4)
# ----------------------------------------------------------------------------
def vit_forward(p, img):
    """img: (B, 1, 80, 16) NCHW -> (B, 512) cls embedding."""
    B, C, H, W = img.shape
    ph = pw = 4
    h, w = H // ph, W // pw
    D, heads, dh = 512, 4, 64
    # Rearrange 'b c (h p1) (w p2) -> b (h w) (p1 p2 c)'
    x = img.reshape(B, C, h, ph, w, pw)
    x = jnp.transpose(x, (0, 2, 4, 3, 5, 1)).reshape(B, h * w, ph * pw * C)
    n = h * w
    x = matmul_fused(x.reshape(B * n, ph * pw * C), p["patch_w"],
                     bias=p["patch_b"]).reshape(B, n, D)
    cls = jnp.broadcast_to(p["cls"], (B, 1, D))
    x = jnp.concatenate([cls, x], axis=1)
    x = x + p["pos"][:, :n + 1]
    nt = n + 1
    for layer in p["layers"]:
        # --- attention (PreNorm) ---
        y = layernorm(x.reshape(B * nt, D), layer["ln1_g"], layer["ln1_b"])
        qkv = matmul_fused(y, layer["qkv_w"])                   # (B*nt, 3*heads*dh)
        qkv = qkv.reshape(B, nt, 3, heads, dh)
        q = jnp.transpose(qkv[:, :, 0], (0, 2, 1, 3)).reshape(B * heads, nt, dh)
        k = jnp.transpose(qkv[:, :, 1], (0, 2, 1, 3)).reshape(B * heads, nt, dh)
        v = jnp.transpose(qkv[:, :, 2], (0, 2, 1, 3)).reshape(B * heads, nt, dh)
        o = mha_attention(q, k, v, dh ** -0.5)
        o = jnp.transpose(o.reshape(B, heads, nt, dh),
                          (0, 2, 1, 3)).reshape(B * nt, heads * dh)
        x = matmul_fused(o, layer["out_w"], bias=layer["out_b"],
                         residual=x.reshape(B * nt, D)).reshape(B, nt, D)
        # --- feed-forward (PreNorm) ---
        y = layernorm(x.reshape(B * nt, D), layer["ln2_g"], layer["ln2_b"])
        h1 = matmul_fused(y, layer["ff1_w"], bias=layer["ff1_b"])
        h1 = jax.nn.gelu(h1, approximate=False)   # exact GELU (nn.GELU default); tiny glue
        x = matmul_fused(h1, layer["ff2_w"], bias=layer["ff2_b"],
                         residual=x.reshape(B * nt, D)).reshape(B, nt, D)
    return x[:, 0]                                              # pool = 'cls'


# ----------------------------------------------------------------------------
# Parameter construction (deterministic, synthetic)
# ----------------------------------------------------------------------------
class ParamGen:
    def __init__(self, key):
        self._key = key
        self._n = 0

    def normal(self, shape, std):
        self._n += 1
        return std * jax.random.normal(jax.random.fold_in(self._key, self._n),
                                       shape, jnp.float32)


def _bn_identity(cout):
    # PyTorch BatchNorm2d default: weight=1, bias=0, running_mean=0, running_var=1
    scale = jnp.full((cout,), 1.0 / math.sqrt(1.0 + BN_EPS), jnp.float32)
    shift = jnp.zeros((cout,), jnp.float32)
    return scale, shift


def init_conv(pg, cin, cout, k, with_bn=True):
    w = pg.normal((k, k, cin, cout), math.sqrt(2.0 / (k * k * cin)))
    b = pg.normal((cout,), 0.01)
    if with_bn:
        s, t = _bn_identity(cout)
    else:
        s = jnp.ones((cout,), jnp.float32)
        t = jnp.zeros((cout,), jnp.float32)
    return {"w": w, "b": b, "bn_s": s, "bn_t": t}


def init_dyn(pg, cin, cout, k, K=4):
    hidden = int(cin * 0.25) + 1
    s, t = _bn_identity(cout)
    return {
        "att_fc1_w": pg.normal((hidden, cin), math.sqrt(2.0 / cin)),
        "att_fc2_w": pg.normal((K, hidden), math.sqrt(2.0 / hidden)),
        "att_fc2_b": jnp.zeros((K,), jnp.float32),
        "weight": pg.normal((K, k, k, cin, cout), math.sqrt(2.0 / (k * k * cin))),
        "bias": pg.normal((K, cout), 0.01),
        "bn_s": s, "bn_t": t,
        "temperature": 34.0,
        "K": K,
    }


def init_vit(pg):
    D, inner, mlp = 512, 256, 1024
    layers = []
    for _ in range(3):
        layers.append({
            "ln1_g": jnp.ones((D,), jnp.float32), "ln1_b": jnp.zeros((D,), jnp.float32),
            "qkv_w": pg.normal((D, 3 * inner), math.sqrt(1.0 / D)),
            "out_w": pg.normal((inner, D), math.sqrt(1.0 / inner)),
            "out_b": jnp.zeros((D,), jnp.float32),
            "ln2_g": jnp.ones((D,), jnp.float32), "ln2_b": jnp.zeros((D,), jnp.float32),
            "ff1_w": pg.normal((D, mlp), math.sqrt(1.0 / D)),
            "ff1_b": jnp.zeros((mlp,), jnp.float32),
            "ff2_w": pg.normal((mlp, D), math.sqrt(1.0 / mlp)),
            "ff2_b": jnp.zeros((D,), jnp.float32),
        })
    return {
        "patch_w": pg.normal((16, D), math.sqrt(1.0 / 16)),
        "patch_b": jnp.zeros((D,), jnp.float32),
        "pos": pg.normal((1, 81, D), 1.0),
        "cls": pg.normal((1, 1, D), 1.0),
        "layers": layers,
    }


ENC_DEF = [
    [("conv", 6, 16, 7, 1, 3, False)],
    [("conv", 16, 32, 3, 2, 1, False)] + [("conv", 32, 32, 3, 1, 1, True)] * 2,
    [("conv", 32, 64, 3, 2, 1, False)] + [("conv", 64, 64, 3, 1, 1, True)] * 3,
    [("conv", 64, 128, 3, 2, 1, False)] + [("conv", 128, 128, 3, 1, 1, True)] * 2,
    [("conv", 128, 256, 3, 2, 1, False)] + [("conv", 256, 256, 3, 1, 1, True)] * 2,
    [("conv", 256, 512, 3, 2, 1, False), ("conv", 512, 512, 3, 1, 1, True)],
    [("conv", 512, 512, 3, 1, 0, False), ("conv", 512, 512, 1, 1, 0, False)],
]

DEC_DEF = [
    [("conv", 512, 512, 1, 1, 0, False)],
    [("convT", 1024, 512, 3, 1, 0, 0), ("conv", 512, 512, 3, 1, 1, True)],
    [("convT", 1024, 512, 3, 2, 1, 1)] + [("conv", 512, 512, 3, 1, 1, True)] * 2,
    [("convT", 768, 384, 3, 2, 1, 1)] + [("conv", 384, 384, 3, 1, 1, True)] * 2,
    [("convT", 512, 256, 3, 2, 1, 1)] + [("conv", 256, 256, 3, 1, 1, True)] * 2,
    [("convT", 320, 128, 3, 2, 1, 1)] + [("dyn", 128, 128, 3, 1, 1, True)] * 2,
    [("convT", 160, 64, 3, 2, 1, 1)] + [("dyn", 64, 64, 3, 1, 1, True)] * 2,
]

OUT_DEF = [("dyn", 80, 32, 3, 1, 1, False), ("plainconv", 32, 3, 1, 1, 0)]


def _build_blocks(pg, defs):
    blocks = []
    for blk in defs:
        layers = []
        for spec in blk:
            kind = spec[0]
            if kind == "conv":
                _, cin, cout, k, s, pd, res = spec
                layers.append(("conv", (k, s, pd, res), init_conv(pg, cin, cout, k)))
            elif kind == "convT":
                _, cin, cout, k, s, pd, op = spec
                layers.append(("convT", (k, s, pd, op), init_conv(pg, cin, cout, k)))
            elif kind == "dyn":
                _, cin, cout, k, s, pd, res = spec
                layers.append(("dyn", (k, pd, res), init_dyn(pg, cin, cout, k)))
            elif kind == "plainconv":
                _, cin, cout, k, s, pd = spec
                layers.append(("plainconv", (k, s, pd),
                               init_conv(pg, cin, cout, k, with_bn=False)))
        blocks.append(layers)
    return blocks


def init_wtldt_params(key):
    pg = ParamGen(key)
    return {
        "vit": init_vit(pg),
        "enc": _build_blocks(pg, ENC_DEF),
        "dec": _build_blocks(pg, DEC_DEF),
        "out": _build_blocks(pg, [OUT_DEF])[0],
    }


def apply_layer(layer, x):
    kind, cfg, p = layer
    if kind == "conv":
        k, s, pd, res = cfg
        return conv_block(x, p, k, s, (pd, pd, pd, pd), res, "relu")
    if kind == "convT":
        k, s, pd, op = cfg
        return conv_transpose_block(x, p, k, s, pd, op)
    if kind == "dyn":
        k, pd, res = cfg
        return dyn_conv_block(x, p, k, pd, res, "relu")
    if kind == "plainconv":
        k, s, pd = cfg
        return conv_block(x, p, k, s, (pd, pd, pd, pd), False, "sigmoid",
                          out_dtype=jnp.float32)
    raise ValueError(kind)


# ----------------------------------------------------------------------------
# WTLDT forward
# ----------------------------------------------------------------------------
def wtldt_forward(params, audio_sequences, face_sequences):
    """audio_sequences: (B,1,80,16) [or (B,T,1,80,16)]; face_sequences: (B,6,96,96)
    [or (B,6,T,96,96)] in PyTorch NCHW convention.  Returns NCHW output."""
    B = audio_sequences.shape[0]
    input_dim_size = face_sequences.ndim
    if input_dim_size > 4:
        audio_sequences = jnp.concatenate(
            [audio_sequences[:, i] for i in range(audio_sequences.shape[1])], axis=0)
        face_sequences = jnp.concatenate(
            [face_sequences[:, :, i] for i in range(face_sequences.shape[2])], axis=0)

    # --- audio encoder (ViT) ---
    audio_embedding = vit_forward(params["vit"], audio_sequences)    # (N, 512)
    N = audio_embedding.shape[0]

    # --- face encoder (activations kept in bf16 between layers) ---
    x = jnp.transpose(face_sequences, (0, 2, 3, 1)).astype(jnp.bfloat16)  # NCHW -> NHWC
    feats = []
    for blk in params["enc"]:
        for layer in blk:
            x = apply_layer(layer, x)
        feats.append(x)

    # --- face decoder with skip connections ---
    x = audio_embedding.reshape(N, 1, 1, 512).astype(jnp.bfloat16)   # unsqueeze(2,3), NHWC
    for blk in params["dec"]:
        for layer in blk:
            x = apply_layer(layer, x)
        x = jnp.concatenate([x, feats[-1]], axis=-1)                 # torch.cat(dim=1)
        feats.pop()

    # --- output block ---
    for layer in params["out"]:
        x = apply_layer(layer, x)

    x = jnp.transpose(x, (0, 3, 1, 2))                               # NHWC -> NCHW
    if input_dim_size > 4:
        chunks = jnp.split(x, x.shape[0] // B, axis=0)
        return jnp.stack(chunks, axis=2)
    return x


if __name__ == "__main__":
    key = jax.random.PRNGKey(0)
    params = init_wtldt_params(key)

    # Smallest shapes consistent with the architecture: the encoder/decoder skip
    # connections require 96x96 faces, and the ViT requires (80,16) mel windows.
    ka, kf = jax.random.split(jax.random.fold_in(key, 12345))
    audio = jax.random.normal(ka, (2, 1, 80, 16), jnp.float32)
    face = jax.random.uniform(kf, (2, 6, 96, 96), jnp.float32)

    out = wtldt_forward(params, audio, face)
    out = jax.block_until_ready(out)

    assert out.shape == (2, 3, 96, 96), out.shape
    assert bool(jnp.all(jnp.isfinite(out)))
    assert bool(jnp.all((out >= 0.0) & (out <= 1.0)))   # sigmoid output
    print("KERNEL_OK")
</pallas_src>

<mosaic_0001>
module attributes {stable_mosaic.version = 11 : i64} {
  func.func @kernel(%arg0: i32, %arg1: i32, %arg2: i32, %arg3: i32, %arg4: memref<1x160x16xbf16, #tpu.memory_space<vmem>>, %arg5: memref<1x16x512xbf16, #tpu.memory_space<vmem>>, %arg6: memref<1x1x512xf32, #tpu.memory_space<vmem>>, %arg7: memref<1x160x512xf32, #tpu.memory_space<vmem>>, %arg8: memref<160x512xf32, #tpu.memory_space<vmem>>) attributes {dimension_semantics = [#tpu.dimension_semantics<parallel>, #tpu.dimension_semantics<parallel>, #tpu.dimension_semantics<parallel>, #tpu.dimension_semantics<arbitrary>], iteration_bounds = array<i64: 1, 1, 1, 1>, scalar_prefetch = 0 : i64, scratch_operands = 1 : i64, tpu.core_type = #tpu.core_type<tc>, window_params = [{transform_indices = @transform_0, window_bounds = array<i64: 1, 160, 16>}, {transform_indices = @transform_1, window_bounds = array<i64: 1, 16, 512>}, {transform_indices = @transform_2, window_bounds = array<i64: 1, 1, 512>}, {transform_indices = @transform_3, window_bounds = array<i64: 1, 160, 512>}]} {
    %c0_i32 = arith.constant 0 : i32
    %0 = arith.cmpi eq, %arg3, %c0_i32 : i32
    %1 = arith.extui %0 : i1 to i32
    %c0_i32_0 = arith.constant 0 : i32
    %2 = arith.cmpi ne, %1, %c0_i32_0 : i32
    scf.if %2 {
      %cst_12 = arith.constant 0.000000e+00 : f32
      %14 = vector.broadcast %cst_12 : f32 to vector<160x512xf32>
      %c0_13 = arith.constant 0 : index
      %c0_14 = arith.constant 0 : index
      %15 = vector.load %arg8[%c0_13, %c0_14] : memref<160x512xf32, #tpu.memory_space<vmem>>, vector<160x512xf32>
      tpu.vector_store %arg8[%c0_13, %c0_14], %14 {strides = array<i32>} : memref<160x512xf32, #tpu.memory_space<vmem>>, vector<160x512xf32>,
    } else {
    }
    %c0 = arith.constant 0 : index
    %c0_1 = arith.constant 0 : index
    %3 = vector.load %arg8[%c0, %c0_1] : memref<160x512xf32, #tpu.memory_space<vmem>>, vector<160x512xf32>
    %c0_2 = arith.constant 0 : index
    %c0_3 = arith.constant 0 : index
    %c0_4 = arith.constant 0 : index
    %4 = vector.load %arg4[%c0_2, %c0_3, %c0_4] : memref<1x160x16xbf16, #tpu.memory_space<vmem>>, vector<1x160x16xbf16>
    %5 = vector.shape_cast %4 : vector<1x160x16xbf16> to vector<160x16xbf16>
    %c0_5 = arith.constant 0 : index
    %c0_6 = arith.constant 0 : index
    %c0_7 = arith.constant 0 : index
    %6 = vector.load %arg5[%c0_5, %c0_6, %c0_7] : memref<1x16x512xbf16, #tpu.memory_space<vmem>>, vector<1x16x512xbf16>
    %7 = vector.shape_cast %6 : vector<1x16x512xbf16> to vector<16x512xbf16>
    %cst = arith.constant dense<0.000000e+00> : vector<160x512xf32>
    %8 = tpu.matmul %5, %7, %cst {dimension_numbers = #tpu.dot_dimension_numbers<[1], [0], [0], [1], [0, 0, 1, 1], [], []>} : vector<160x16xbf16>, vector<16x512xbf16>, vector<160x512xf32> -> vector<160x512xf32>
    %9 = arith.addf %3, %8 : vector<160x512xf32>
    %c0_8 = arith.constant 0 : index
    %c0_9 = arith.constant 0 : index
    %10 = vector.load %arg8[%c0_8, %c0_9] : memref<160x512xf32, #tpu.memory_space<vmem>>, vector<160x512xf32>
    tpu.vector_store %arg8[%c0_8, %c0_9], %9 {strides = array<i32>} : memref<160x512xf32, #tpu.memory_space<vmem>>, vector<160x512xf32>,
    %c0_i32_10 = arith.constant 0 : i32
    %11 = arith.cmpi eq, %arg3, %c0_i32_10 : i32
    %12 = arith.extui %11 : i1 to i32
    %c0_i32_11 = arith.constant 0 : i32
    %13 = arith.cmpi ne, %12, %c0_i32_11 : i32
    scf.if %13 {
      %c0_12 = arith.constant 0 : index
      %c0_13 = arith.constant 0 : index
      %14 = vector.load %arg8[%c0_12, %c0_13] : memref<160x512xf32, #tpu.memory_space<vmem>>, vector<160x512xf32>
      %c0_14 = arith.constant 0 : index
      %c0_15 = arith.constant 0 : index
      %c0_16 = arith.constant 0 : index
      %15 = vector.load %arg6[%c0_14, %c0_15, %c0_16] : memref<1x1x512xf32, #tpu.memory_space<vmem>>, vector<1x1x512xf32>
      %16 = vector.shape_cast %15 : vector<1x1x512xf32> to vector<1x512xf32>
      %17 = vector.broadcast %16 : vector<1x512xf32> to vector<160x512xf32>
      %18 = arith.addf %14, %17 : vector<160x512xf32>
      %c0_17 = arith.constant 0 : index
      %c0_18 = arith.constant 0 : index
      %c0_19 = arith.constant 0 : index
      %19 = vector.load %arg7[%c0_17, %c0_18, %c0_19] : memref<1x160x512xf32, #tpu.memory_space<vmem>>, vector<1x160x512xf32>
      %20 = vector.shape_cast %19 : vector<1x160x512xf32> to vector<160x512xf32>
      %21 = vector.shape_cast %18 : vector<160x512xf32> to vector<1x160x512xf32>
      tpu.vector_store %arg7[%c0_17, %c0_18, %c0_19], %21 {strides = array<i32>} : memref<1x160x512xf32, #tpu.memory_space<vmem>>, vector<1x160x512xf32>,
    } else {
    }
    return
  }
  func.func @transform_0(%arg0: i32, %arg1: i32, %arg2: i32, %arg3: i32) -> (i32, i32, i32) {
    %c0_i32 = arith.constant 0 : i32
    return %arg0, %arg1, %arg3 : i32, i32, i32
  }
  func.func @transform_1(%arg0: i32, %arg1: i32, %arg2: i32, %arg3: i32) -> (i32, i32, i32) {
    %c0_i32 = arith.constant 0 : i32
    return %arg0, %arg3, %arg2 : i32, i32, i32
  }
  func.func @transform_2(%arg0: i32, %arg1: i32, %arg2: i32, %arg3: i32) -> (i32, i32, i32) {
    %c0_i32 = arith.constant 0 : i32
    %c0_i32_0 = arith.constant 0 : i32
    return %arg0, %c0_i32, %arg2 : i32, i32, i32
  }
  func.func @transform_3(%arg0: i32, %arg1: i32, %arg2: i32, %arg3: i32) -> (i32, i32, i32) {
    %c0_i32 = arith.constant 0 : i32
    return %arg0, %arg1, %arg2 : i32, i32, i32
  }
}

</mosaic_0001>

<bundles_post_ra>
// kernel: tpu_custom_call.1
= control target key start
LH: loop header
LB: loop body
LE: loop exit
PB: predicated region body
PF: predicated region fallthrough
CT: control target
= control target key end

     0   :  { %vm274_vm0 = vcmask 130048   ;;  %s1322_s0 = inlined_call_operand.vmem [shape: bf16[1,160,16], index: 0, kind: input, shape index: {}]   ;;  %s1323_s1 = inlined_call_operand.vmem [shape: bf16[1,16,512], index: 1, kind: input, shape index: {}]   ;;  %s1324_s2 = inlined_call_operand.vmem [shape: f32[1,1,512], index: 2, kind: input, shape index: {}]   ;;  %s1325_s3 = inlined_call_operand.hbm [shape: f32[1,160,512], index: 3, kind: output, shape index: {}]  }
   0x1   :  { %v1014_v0 = vld [vmem:[%s1323_s1] sm:$0xf]  ;;  %v1080_v1 = vld [vmem:[%s1323_s1 + $0xc] sm:$0xf0]  ;;  %v1078_v2 = vld [vmem:[%s1323_s1 + $0x4] sm:$0xf] }
   0x2   :  { %v1015_v3 = vor.u32 %v1080_v1, %v1014_v0  ;;  %v1016_v4 = vld [vmem:[%s1323_s1 + $0x10] sm:$0xf0]  ;;  %v1022_v5 = vld [vmem:[%s1323_s1 + $0x8] sm:$0xf]  ;;  %v1081_v6 = vld [vmem:[%s1323_s1 + $0x14] sm:$0xf0] }
   0x3   :  { %v1019_v7 = vor.u32 %v1078_v2, %v1016_v4  ;;  %v1023_v8 = vor.u32 %v1081_v6, %v1022_v5  ;;  %v1079_v9 = vld [vmem:[%s1323_s1 + $0xc] sm:$0xf]  ;;  %v1024_v10 = vld [vmem:[%s1323_s1 + $0x18] sm:$0xf0]  ;;  %v1068_v11 = vld [vmem:[%s1322_s0] sm:$0xff] }
   0x4   :  { %312 = vmatpush.bf16.msra.mxu0 %v1015_v3  ;;  %v1027_v12 = vor.u32 %v1079_v9, %v1024_v10 }
   0x5   :  { %8 = vsyncpa [#allocation4], 0  ;;  %371 = vmatpush.bf16.msra.mxu1 %v1019_v7  ;;  %430 = vmatpush.bf16.msra.mxu2 %v1023_v8  ;;  %v1069_v13 = vld [vmem:[%s1322_s0 + $0x8] sm:$0xff]  ;;  %v1070_v14 = vld [vmem:[%s1322_s0 + $0x10] sm:$0xff]  ;;  %s960_s24 = sshll.u32 %s1325_s3, 4  ;;  %s1112_s25 = smov 512   ;;  %s961_s24 = int_to_ptr.hbm [resolvable:$true] %s960_s24 }
   0x6   :  { %489 = vmatpush.bf16.msra.mxu3 %v1027_v12  ;;  %v1071_v15 = vld [vmem:[%s1322_s0 + $0x18] sm:$0xff]  ;;  %v1072_v16 = vld [vmem:[%s1322_s0 + $0x20] sm:$0xff]  ;;  %v1073_v17 = vld [vmem:[%s1322_s0 + $0x28] sm:$0xff]  ;;  %s1113_s26 = smov 32  }
   0x7   :  { %1028 = vmatmul.msk.bf16.vlgmr.msra.gmra.mxu0 %vm274_vm0, %v1068_v11  ;;  %v1074_v18 = vld [vmem:[%s1322_s0 + $0x30] sm:$0xff]  ;;  %v1075_v19 = vld [vmem:[%s1322_s0 + $0x38] sm:$0xff]  ;;  %v784_v20 = vld [vmem:[%s1324_s2] sm:$0xf] }
   0x8   :  { %1038 = vmatmul.msk.bf16.vlgmr.msra.gmra.mxu1 %vm274_vm0, %v1068_v11  ;;  %1048 = vmatmul.msk.bf16.vlgmr.msra.gmra.mxu2 %vm274_vm0, %v1068_v11  ;;  %v1217_v21 = vperm.slane %v784_v20, 0  ;;  %v1219_v22 = vperm.slane %v784_v20, 1  ;;  %v1076_v23 = vld [vmem:[%s1322_s0 + $0x40] sm:$0xff]  ;;  %v1229_v28 = vperm.slane %v784_v20, 2  ;;  %v1232_v29 = vperm.slane %v784_v20, 3  ;;  %v1077_v39 = vld [vmem:[%s1322_s0 + $0x48] sm:$0xff] }
   0x9   :  { %1058 = vmatmul.msk.bf16.vlgmr.msra.gmra.mxu3 %vm274_vm0, %v1068_v11  ;;  %s1111_s0 = smov [#allocation3]  }
   0xa   :  { %s958_s21 = sshll.u32 %s1111_s0, 4  ;;  %s959_s21 = int_to_ptr.vmem [resolvable:$true] %s958_s21 }
  0x17   :  { %1029 = vmatmul.msk.bf16.gmra.mxu0 %vm274_vm0, %v1069_v13 }
  0x18   :  { %1039 = vmatmul.msk.bf16.gmra.mxu1 %vm274_vm0, %v1069_v13  ;;  %1049 = vmatmul.msk.bf16.gmra.mxu2 %vm274_vm0, %v1069_v13 }
  0x19   :  { %1059 = vmatmul.msk.bf16.gmra.mxu3 %vm274_vm0, %v1069_v13 }
  0x27   :  { %1030 = vmatmul.msk.bf16.gmra.mxu0 %vm274_vm0, %v1070_v14 }
  0x28   :  { %1040 = vmatmul.msk.bf16.gmra.mxu1 %vm274_vm0, %v1070_v14  ;;  %1050 = vmatmul.msk.bf16.gmra.mxu2 %vm274_vm0, %v1070_v14 }
  0x29   :  { %1060 = vmatmul.msk.bf16.gmra.mxu3 %vm274_vm0, %v1070_v14 }
  0x37   :  { %1031 = vmatmul.msk.bf16.gmra.mxu0 %vm274_vm0, %v1071_v15 }
  0x38   :  { %1041 = vmatmul.msk.bf16.gmra.mxu1 %vm274_vm0, %v1071_v15  ;;  %1051 = vmatmul.msk.bf16.gmra.mxu2 %vm274_vm0, %v1071_v15 }
  0x39   :  { %1061 = vmatmul.msk.bf16.gmra.mxu3 %vm274_vm0, %v1071_v15 }
  0x47   :  { %1032 = vmatmul.msk.bf16.gmra.mxu0 %vm274_vm0, %v1072_v16 }
  0x48   :  { %1042 = vmatmul.msk.bf16.gmra.mxu1 %vm274_vm0, %v1072_v16  ;;  %1052 = vmatmul.msk.bf16.gmra.mxu2 %vm274_vm0, %v1072_v16 }
  0x49   :  { %1062 = vmatmul.msk.bf16.gmra.mxu3 %vm274_vm0, %v1072_v16 }
  0x57   :  { %1033 = vmatmul.msk.bf16.gmra.mxu0 %vm274_vm0, %v1073_v17 }
  0x58   :  { %1043 = vmatmul.msk.bf16.gmra.mxu1 %vm274_vm0, %v1073_v17  ;;  %1053 = vmatmul.msk.bf16.gmra.mxu2 %vm274_vm0, %v1073_v17 }
  0x59   :  { %1063 = vmatmul.msk.bf16.gmra.mxu3 %vm274_vm0, %v1073_v17 }
  0x67   :  { %1034 = vmatmul.msk.bf16.gmra.mxu0 %vm274_vm0, %v1074_v18 }
  0x68   :  { %1044 = vmatmul.msk.bf16.gmra.mxu1 %vm274_vm0, %v1074_v18  ;;  %1054 = vmatmul.msk.bf16.gmra.mxu2 %vm274_vm0, %v1074_v18 }
  0x69   :  { %1064 = vmatmul.msk.bf16.gmra.mxu3 %vm274_vm0, %v1074_v18 }
  0x77   :  { %1035 = vmatmul.msk.bf16.gmra.mxu0 %vm274_vm0, %v1075_v19 }
  0x78   :  { %1045 = vmatmul.msk.bf16.gmra.mxu1 %vm274_vm0, %v1075_v19  ;;  %1055 = vmatmul.msk.bf16.gmra.mxu2 %vm274_vm0, %v1075_v19 }
  0x79   :  { %1065 = vmatmul.msk.bf16.gmra.mxu3 %vm274_vm0, %v1075_v19 }
  0x84   :  { %v314_v24 = vpop.f32.mrf.mxu0 }
  0x85   :  { %v794_v25 = vadd.f32 %v1217_v21, %v314_v24  ;;  %v373_v26 = vpop.f32.mrf.mxu1 }
  0x86   :  { %v795_v27 = vadd.f32 %v1219_v22, %v373_v26 }
  0x87   :  { %874 = vst [vmem:[#allocation3] sm:$0xff] %v794_v25  ;;  %1036 = vmatmul.msk.bf16.gmra.mxu0 %vm274_vm0, %v1076_v23 }
  0x88   :  { %875 = vst [vmem:[#allocation3 + $0x8] sm:$0xff] %v795_v27  ;;  %1046 = vmatmul.msk.bf16.gmra.mxu1 %vm274_vm0, %v1076_v23  ;;  %1056 = vmatmul.msk.bf16.gmra.mxu2 %vm274_vm0, %v1076_v23 }
  0x89   :  { %1066 = vmatmul.msk.bf16.gmra.mxu3 %vm274_vm0, %v1076_v23 }
  0x8b   :  { %v432_v30 = vpop.f32.mrf.mxu2 }
  0x8c   :  { %v796_v31 = vadd.f32 %v1229_v28, %v432_v30  ;;  %v491_v32 = vpop.f32.mrf.mxu3  ;;  %v316_v33 = vpop.f32.mrf.mxu0 }
  0x8d   :  { %v797_v34 = vadd.f32 %v1232_v29, %v491_v32  ;;  %v798_v35 = vadd.f32 %v1217_v21, %v316_v33  ;;  %v375_v36 = vpop.f32.mrf.mxu1 }
  0x8e   :  { %876 = vst [vmem:[#allocation3 + $0x10] sm:$0xff] %v796_v31  ;;  %v799_v37 = vadd.f32 %v1219_v22, %v375_v36 }
  0x8f   :  { %877 = vst [vmem:[#allocation3 + $0x18] sm:$0xff] %v797_v34 }
  0x90   :  { %878 = vst [vmem:[#allocation3 + $0x20] sm:$0xff] %v798_v35 }
  0x91   :  { %879 = vst [vmem:[#allocation3 + $0x28] sm:$0xff] %v799_v37 }
  0x93   :  { %v434_v38 = vpop.f32.mrf.mxu2 }
  0x94   :  { %v800_v40 = vadd.f32 %v1229_v28, %v434_v38  ;;  %v493_v41 = vpop.f32.mrf.mxu3  ;;  %v319_v42 = vpop.f32.mrf.mxu0 }
  0x95   :  { %v801_v43 = vadd.f32 %v1232_v29, %v493_v41  ;;  %v802_v44 = vadd.f32 %v1217_v21, %v319_v42  ;;  %v378_v45 = vpop.f32.mrf.mxu1 }
  0x96   :  { %880 = vst [vmem:[#allocation3 + $0x30] sm:$0xff] %v800_v40  ;;  %v803_v46 = vadd.f32 %v1219_v22, %v378_v45 }
  0x97   :  { %881 = vst [vmem:[#allocation3 + $0x38] sm:$0xff] %v801_v43  ;;  %1037 = vmatmul.msk.bf16.gmra.mxu0 %vm274_vm0, %v1077_v39 }
  0x98   :  { %882 = vst [vmem:[#allocation3 + $0x40] sm:$0xff] %v802_v44  ;;  %1047 = vmatmul.msk.bf16.gmra.mxu1 %vm274_vm0, %v1077_v39  ;;  %1057 = vmatmul.msk.bf16.gmra.mxu2 %vm274_vm0, %v1077_v39 }
  0x99   :  { %883 = vst [vmem:[#allocation3 + $0x48] sm:$0xff] %v803_v46  ;;  %1067 = vmatmul.msk.bf16.gmra.mxu3 %vm274_vm0, %v1077_v39 }
  0x9b   :  { %v437_v47 = vpop.f32.mrf.mxu2 }
  0x9c   :  { %v804_v48 = vadd.f32 %v1229_v28, %v437_v47  ;;  %v496_v49 = vpop.f32.mrf.mxu3  ;;  %v321_v50 = vpop.f32.mrf.mxu0 }
  0x9d   :  { %v805_v51 = vadd.f32 %v1232_v29, %v496_v49  ;;  %v806_v52 = vadd.f32 %v1217_v21, %v321_v50  ;;  %v380_v53 = vpop.f32.mrf.mxu1 }
  0x9e   :  { %884 = vst [vmem:[#allocation3 + $0x50] sm:$0xff] %v804_v48  ;;  %v807_v54 = vadd.f32 %v1219_v22, %v380_v53 }
  0x9f   :  { %885 = vst [vmem:[#allocation3 + $0x58] sm:$0xff] %v805_v51 }
  0xa0   :  { %886 = vst [vmem:[#allocation3 + $0x60] sm:$0xff] %v806_v52 }
  0xa1   :  { %887 = vst [vmem:[#allocation3 + $0x68] sm:$0xff] %v807_v54 }
  0xa3   :  { %v439_v55 = vpop.f32.mrf.mxu2 }
  0xa4   :  { %v808_v56 = vadd.f32 %v1229_v28, %v439_v55  ;;  %v498_v57 = vpop.f32.mrf.mxu3  ;;  %v324_v58 = vpop.f32.mrf.mxu0 }
  0xa5   :  { %v809_v59 = vadd.f32 %v1232_v29, %v498_v57  ;;  %v810_v60 = vadd.f32 %v1217_v21, %v324_v58  ;;  %v383_v61 = vpop.f32.mrf.mxu1 }
  0xa6   :  { %888 = vst [vmem:[#allocation3 + $0x70] sm:$0xff] %v808_v56  ;;  %v811_v62 = vadd.f32 %v1219_v22, %v383_v61 }
  0xa7   :  { %889 = vst [vmem:[#allocation3 + $0x78] sm:$0xff] %v809_v59 }
  0xa8   :  { %890 = vst [vmem:[#allocation3 + $0x80] sm:$0xff] %v810_v60 }
  0xa9   :  { %891 = vst [vmem:[#allocation3 + $0x88] sm:$0xff] %v811_v62 }
  0xab   :  { %v442_v63 = vpop.f32.mrf.mxu2 }
  0xac   :  { %v812_v0 = vadd.f32 %v1229_v28, %v442_v63  ;;  %v501_v1 = vpop.f32.mrf.mxu3  ;;  %v326_v2 = vpop.f32.mrf.mxu0 }
  0xad   :  { %v813_v3 = vadd.f32 %v1232_v29, %v501_v1  ;;  %v814_v4 = vadd.f32 %v1217_v21, %v326_v2  ;;  %v385_v5 = vpop.f32.mrf.mxu1 }
  0xae   :  { %892 = vst [vmem:[#allocation3 + $0x90] sm:$0xff] %v812_v0  ;;  %v815_v6 = vadd.f32 %v1219_v22, %v385_v5 }
  0xaf   :  { %893 = vst [vmem:[#allocation3 + $0x98] sm:$0xff] %v813_v3 }
  0xb0   :  { %894 = vst [vmem:[#allocation3 + $0xa0] sm:$0xff] %v814_v4 }
  0xb1   :  { %895 = vst [vmem:[#allocation3 + $0xa8] sm:$0xff] %v815_v6 }
  0xb3   :  { %v444_v7 = vpop.f32.mrf.mxu2 }
  0xb4   :  { %v816_v8 = vadd.f32 %v1229_v28, %v444_v7  ;;  %v503_v9 = vpop.f32.mrf.mxu3  ;;  %v329_v10 = vpop.f32.mrf.mxu0 }
  0xb5   :  { %v817_v11 = vadd.f32 %v1232_v29, %v503_v9  ;;  %v818_v12 = vadd.f32 %v1217_v21, %v329_v10  ;;  %v388_v13 = vpop.f32.mrf.mxu1 }
  0xb6   :  { %896 = vst [vmem:[#allocation3 + $0xb0] sm:$0xff] %v816_v8  ;;  %v819_v14 = vadd.f32 %v1219_v22, %v388_v13 }
  0xb7   :  { %897 = vst [vmem:[#allocation3 + $0xb8] sm:$0xff] %v817_v11 }
  0xb8   :  { %898 = vst [vmem:[#allocation3 + $0xc0] sm:$0xff] %v818_v12 }
  0xb9   :  { %899 = vst [vmem:[#allocation3 + $0xc8] sm:$0xff] %v819_v14 }
  0xbb   :  { %v447_v15 = vpop.f32.mrf.mxu2 }
  0xbc   :  { %v820_v16 = vadd.f32 %v1229_v28, %v447_v15  ;;  %v506_v17 = vpop.f32.mrf.mxu3  ;;  %v331_v18 = vpop.f32.mrf.mxu0 }
  0xbd   :  { %v821_v19 = vadd.f32 %v1232_v29, %v506_v17  ;;  %v822_v20 = vadd.f32 %v1217_v21, %v331_v18  ;;  %v390_v23 = vpop.f32.mrf.mxu1 }
  0xbe   :  { %900 = vst [vmem:[#allocation3 + $0xd0] sm:$0xff] %v820_v16  ;;  %v823_v24 = vadd.f32 %v1219_v22, %v390_v23 }
  0xbf   :  { %901 = vst [vmem:[#allocation3 + $0xd8] sm:$0xff] %v821_v19 }
  0xc0   :  { %902 = vst [vmem:[#allocation3 + $0xe0] sm:$0xff] %v822_v20 }
  0xc1   :  { %903 = vst [vmem:[#allocation3 + $0xe8] sm:$0xff] %v823_v24 }
  0xc3   :  { %v449_v25 = vpop.f32.mrf.mxu2 }
  0xc4   :  { %v824_v26 = vadd.f32 %v1229_v28, %v449_v25  ;;  %v508_v27 = vpop.f32.mrf.mxu3  ;;  %v334_v30 = vpop.f32.mrf.mxu0 }
  0xc5   :  { %v825_v31 = vadd.f32 %v1232_v29, %v508_v27  ;;  %v826_v32 = vadd.f32 %v1217_v21, %v334_v30  ;;  %v393_v33 = vpop.f32.mrf.mxu1 }
  0xc6   :  { %904 = vst [vmem:[#allocation3 + $0xf0] sm:$0xff] %v824_v26  ;;  %v827_v34 = vadd.f32 %v1219_v22, %v393_v33 }
  0xc7   :  { %905 = vst [vmem:[#allocation3 + $0xf8] sm:$0xff] %v825_v31 }
  0xc8   :  { %906 = vst [vmem:[#allocation3 + $0x100] sm:$0xff] %v826_v32 }
  0xc9   :  { %907 = vst [vmem:[#allocation3 + $0x108] sm:$0xff] %v827_v34 }
  0xcb   :  { %v452_v35 = vpop.f32.mrf.mxu2 }
  0xcc   :  { %v828_v36 = vadd.f32 %v1229_v28, %v452_v35  ;;  %v511_v37 = vpop.f32.mrf.mxu3  ;;  %v336_v38 = vpop.f32.mrf.mxu0 }
  0xcd   :  { %v829_v39 = vadd.f32 %v1232_v29, %v511_v37  ;;  %v830_v40 = vadd.f32 %v1217_v21, %v336_v38  ;;  %v395_v41 = vpop.f32.mrf.mxu1 }
  0xce   :  { %908 = vst [vmem:[#allocation3 + $0x110] sm:$0xff] %v828_v36  ;;  %v831_v42 = vadd.f32 %v1219_v22, %v395_v41 }
  0xcf   :  { %909 = vst [vmem:[#allocation3 + $0x118] sm:$0xff] %v829_v39 }
  0xd0   :  { %910 = vst [vmem:[#allocation3 + $0x120] sm:$0xff] %v830_v40 }
  0xd1   :  { %911 = vst [vmem:[#allocation3 + $0x128] sm:$0xff] %v831_v42 }
  0xd3   :  { %v454_v43 = vpop.f32.mrf.mxu2 }
  0xd4   :  { %v832_v44 = vadd.f32 %v1229_v28, %v454_v43  ;;  %v513_v45 = vpop.f32.mrf.mxu3  ;;  %v339_v46 = vpop.f32.mrf.mxu0 }
  0xd5   :  { %v833_v47 = vadd.f32 %v1232_v29, %v513_v45  ;;  %v834_v48 = vadd.f32 %v1217_v21, %v339_v46  ;;  %v398_v49 = vpop.f32.mrf.mxu1 }
  0xd6   :  { %912 = vst [vmem:[#allocation3 + $0x130] sm:$0xff] %v832_v44  ;;  %v835_v50 = vadd.f32 %v1219_v22, %v398_v49 }
  0xd7   :  { %913 = vst [vmem:[#allocation3 + $0x138] sm:$0xff] %v833_v47 }
  0xd8   :  { %914 = vst [vmem:[#allocation3 + $0x140] sm:$0xff] %v834_v48 }
  0xd9   :  { %915 = vst [vmem:[#allocation3 + $0x148] sm:$0xff] %v835_v50 }
  0xdb   :  { %v457_v51 = vpop.f32.mrf.mxu2 }
  0xdc   :  { %v836_v52 = vadd.f32 %v1229_v28, %v457_v51  ;;  %v516_v53 = vpop.f32.mrf.mxu3  ;;  %v341_v54 = vpop.f32.mrf.mxu0 }
  0xdd   :  { %v837_v55 = vadd.f32 %v1232_v29, %v516_v53  ;;  %v838_v56 = vadd.f32 %v1217_v21, %v341_v54  ;;  %v400_v57 = vpop.f32.mrf.mxu1 }
  0xde   :  { %916 = vst [vmem:[#allocation3 + $0x150] sm:$0xff] %v836_v52  ;;  %v839_v58 = vadd.f32 %v1219_v22, %v400_v57 }
  0xdf   :  { %917 = vst [vmem:[#allocation3 + $0x158] sm:$0xff] %v837_v55 }
  0xe0   :  { %918 = vst [vmem:[#allocation3 + $0x160] sm:$0xff] %v838_v56 }
  0xe1   :  { %919 = vst [vmem:[#allocation3 + $0x168] sm:$0xff] %v839_v58 }
  0xe3   :  { %v459_v59 = vpop.f32.mrf.mxu2 }
  0xe4   :  { %v840_v60 = vadd.f32 %v1229_v28, %v459_v59  ;;  %v518_v61 = vpop.f32.mrf.mxu3  ;;  %v344_v62 = vpop.f32.mrf.mxu0 }
  0xe5   :  { %v841_v63 = vadd.f32 %v1232_v29, %v518_v61  ;;  %v842_v0 = vadd.f32 %v1217_v21, %v344_v62  ;;  %v403_v1 = vpop.f32.mrf.mxu1 }
  0xe6   :  { %920 = vst [vmem:[#allocation3 + $0x170] sm:$0xff] %v840_v60  ;;  %v843_v2 = vadd.f32 %v1219_v22, %v403_v1 }
  0xe7   :  { %921 = vst [vmem:[#allocation3 + $0x178] sm:$0xff] %v841_v63 }
  0xe8   :  { %922 = vst [vmem:[#allocation3 + $0x180] sm:$0xff] %v842_v0 }
  0xe9   :  { %923 = vst [vmem:[#allocation3 + $0x188] sm:$0xff] %v843_v2 }
  0xeb   :  { %v462_v3 = vpop.f32.mrf.mxu2 }
  0xec   :  { %v844_v4 = vadd.f32 %v1229_v28, %v462_v3  ;;  %v521_v5 = vpop.f32.mrf.mxu3  ;;  %v346_v6 = vpop.f32.mrf.mxu0 }
  0xed   :  { %v845_v7 = vadd.f32 %v1232_v29, %v521_v5  ;;  %v846_v8 = vadd.f32 %v1217_v21, %v346_v6  ;;  %v405_v9 = vpop.f32.mrf.mxu1 }
  0xee   :  { %924 = vst [vmem:[#allocation3 + $0x190] sm:$0xff] %v844_v4  ;;  %v847_v10 = vadd.f32 %v1219_v22, %v405_v9 }
  0xef   :  { %925 = vst [vmem:[#allocation3 + $0x198] sm:$0xff] %v845_v7 }
  0xf0   :  { %926 = vst [vmem:[#allocation3 + $0x1a0] sm:$0xff] %v846_v8 }
  0xf1   :  { %927 = vst [vmem:[#allocation3 + $0x1a8] sm:$0xff] %v847_v10 }
  0xf3   :  { %v464_v11 = vpop.f32.mrf.mxu2 }
  0xf4   :  { %v848_v12 = vadd.f32 %v1229_v28, %v464_v11  ;;  %v523_v13 = vpop.f32.mrf.mxu3  ;;  %v349_v14 = vpop.f32.mrf.mxu0 }
  0xf5   :  { %v849_v15 = vadd.f32 %v1232_v29, %v523_v13  ;;  %v850_v16 = vadd.f32 %v1217_v21, %v349_v14  ;;  %v408_v17 = vpop.f32.mrf.mxu1 }
  0xf6   :  { %928 = vst [vmem:[#allocation3 + $0x1b0] sm:$0xff] %v848_v12  ;;  %v851_v18 = vadd.f32 %v1219_v22, %v408_v17 }
  0xf7   :  { %929 = vst [vmem:[#allocation3 + $0x1b8] sm:$0xff] %v849_v15 }
  0xf8   :  { %930 = vst [vmem:[#allocation3 + $0x1c0] sm:$0xff] %v850_v16 }
  0xf9   :  { %931 = vst [vmem:[#allocation3 + $0x1c8] sm:$0xff] %v851_v18 }
  0xfb   :  { %v467_v19 = vpop.f32.mrf.mxu2 }
  0xfc   :  { %v852_v20 = vadd.f32 %v1229_v28, %v467_v19  ;;  %v526_v23 = vpop.f32.mrf.mxu3  ;;  %v351_v24 = vpop.f32.mrf.mxu0 }
  0xfd   :  { %v853_v25 = vadd.f32 %v1232_v29, %v526_v23  ;;  %v854_v26 = vadd.f32 %v1217_v21, %v351_v24  ;;  %v410_v27 = vpop.f32.mrf.mxu1 }
  0xfe   :  { %932 = vst [vmem:[#allocation3 + $0x1d0] sm:$0xff] %v852_v20  ;;  %v855_v30 = vadd.f32 %v1219_v22, %v410_v27 }
  0xff   :  { %933 = vst [vmem:[#allocation3 + $0x1d8] sm:$0xff] %v853_v25 }
 0x100   :  { %934 = vst [vmem:[#allocation3 + $0x1e0] sm:$0xff] %v854_v26 }
 0x101   :  { %935 = vst [vmem:[#allocation3 + $0x1e8] sm:$0xff] %v855_v30 }
 0x103   :  { %v469_v31 = vpop.f32.mrf.mxu2 }
 0x104   :  { %v856_v32 = vadd.f32 %v1229_v28, %v469_v31  ;;  %v528_v33 = vpop.f32.mrf.mxu3  ;;  %v354_v34 = vpop.f32.mrf.mxu0 }
 0x105   :  { %v857_v35 = vadd.f32 %v1232_v29, %v528_v33  ;;  %v858_v36 = vadd.f32 %v1217_v21, %v354_v34  ;;  %v413_v37 = vpop.f32.mrf.mxu1 }
 0x106   :  { %936 = vst [vmem:[#allocation3 + $0x1f0] sm:$0xff] %v856_v32  ;;  %v859_v38 = vadd.f32 %v1219_v22, %v413_v37 }
 0x107   :  { %937 = vst [vmem:[#allocation3 + $0x1f8] sm:$0xff] %v857_v35 }
 0x108   :  { %938 = vst [vmem:[#allocation3 + $0x200] sm:$0xff] %v858_v36 }
 0x109   :  { %939 = vst [vmem:[#allocation3 + $0x208] sm:$0xff] %v859_v38 }
 0x10b   :  { %v472_v39 = vpop.f32.mrf.mxu2 }
 0x10c   :  { %v860_v40 = vadd.f32 %v1229_v28, %v472_v39  ;;  %v531_v41 = vpop.f32.mrf.mxu3  ;;  %v356_v42 = vpop.f32.mrf.mxu0 }
 0x10d   :  { %v861_v43 = vadd.f32 %v1232_v29, %v531_v41  ;;  %v862_v44 = vadd.f32 %v1217_v21, %v356_v42  ;;  %v415_v45 = vpop.f32.mrf.mxu1 }
 0x10e   :  { %940 = vst [vmem:[#allocation3 + $0x210] sm:$0xff] %v860_v40  ;;  %v863_v46 = vadd.f32 %v1219_v22, %v415_v45 }
 0x10f   :  { %941 = vst [vmem:[#allocation3 + $0x218] sm:$0xff] %v861_v43 }
 0x110   :  { %942 = vst [vmem:[#allocation3 + $0x220] sm:$0xff] %v862_v44 }
 0x111   :  { %943 = vst [vmem:[#allocation3 + $0x228] sm:$0xff] %v863_v46 }
 0x113   :  { %v474_v47 = vpop.f32.mrf.mxu2 }
 0x114   :  { %v864_v48 = vadd.f32 %v1229_v28, %v474_v47  ;;  %v533_v49 = vpop.f32.mrf.mxu3  ;;  %v359_v50 = vpop.f32.mrf.mxu0 }
 0x115   :  { %v865_v51 = vadd.f32 %v1232_v29, %v533_v49  ;;  %v866_v52 = vadd.f32 %v1217_v21, %v359_v50  ;;  %v418_v53 = vpop.f32.mrf.mxu1 }
 0x116   :  { %944 = vst [vmem:[#allocation3 + $0x230] sm:$0xff] %v864_v48  ;;  %v867_v54 = vadd.f32 %v1219_v22, %v418_v53 }
 0x117   :  { %945 = vst [vmem:[#allocation3 + $0x238] sm:$0xff] %v865_v51 }
 0x118   :  { %946 = vst [vmem:[#allocation3 + $0x240] sm:$0xff] %v866_v52 }
 0x119   :  { %947 = vst [vmem:[#allocation3 + $0x248] sm:$0xff] %v867_v54 }
 0x11b   :  { %v477_v55 = vpop.f32.mrf.mxu2 }
 0x11c   :  { %v868_v56 = vadd.f32 %v1229_v28, %v477_v55  ;;  %v536_v57 = vpop.f32.mrf.mxu3  ;;  %v361_v58 = vpop.f32.mrf.mxu0 }
 0x11d   :  { %v869_v59 = vadd.f32 %v1232_v29, %v536_v57  ;;  %v870_v60 = vadd.f32 %v1217_v21, %v361_v58  ;;  %v420_v61 = vpop.f32.mrf.mxu1 }
 0x11e   :  { %948 = vst [vmem:[#allocation3 + $0x250] sm:$0xff] %v868_v56  ;;  %v871_v62 = vadd.f32 %v1219_v22, %v420_v61 }
 0x11f   :  { %949 = vst [vmem:[#allocation3 + $0x258] sm:$0xff] %v869_v59 }
 0x120   :  { %950 = vst [vmem:[#allocation3 + $0x260] sm:$0xff] %v870_v60 }
 0x121   :  { %951 = vst [vmem:[#allocation3 + $0x268] sm:$0xff] %v871_v62 }
 0x123   :  { %v479_v63 = vpop.f32.mrf.mxu2 }
 0x124   :  { %v872_v0 = vadd.f32 %v1229_v28, %v479_v63  ;;  %v538_v1 = vpop.f32.mrf.mxu3 }
 0x125   :  { %v873_v21 = vadd.f32 %v1232_v29, %v538_v1 }
 0x126   :  { %952 = vst [vmem:[#allocation3 + $0x270] sm:$0xff] %v872_v0 }
 0x127   :  { %953 = vst [vmem:[#allocation3 + $0x278] sm:$0xff] %v873_v21 }
 0x128   :  { %966 = dma.vmem_to_hbm [thread:$0]  %s959_s21, 10240, %s961_s24, [#allocation4], %s1112_s25, %s1112_s25, %s1113_s26  }
 0x129   :  { %1109 = dma.done.wait [#allocation4], 10240  }
 0x12a   :  { %1110 = vsyncadd [#allocation4], 4294957056 }
 0x12b   :  { %971 = vsyncpa [#allocation4], 1 }

</bundles_post_ra>
